<compile_context>
chip_gen: v7x
topology: tpu7x:2x2x1
jax: 0.10.0
libtpu: 0.0.40
codegen_flags: <defaults>
</compile_context>

<pallas_src>
import functools

import jax
import jax.numpy as jnp
from jax import lax
from jax.experimental import pallas as pl
from jax.experimental.pallas import tpu as pltpu


def _focal_kernel(*refs, gamma, spatial, tile_s, tiles_per_split,
                  has_alpha, needs_mask):
    """One (batch-block nb, spatial-split p, spatial tile h) grid step.

    x_ref:      (B, C, T) logits (native dtype), class on sublanes, spatial on lanes
    t_ref:      (B, 1, T) i32 target class ids
    alpha_ref:  (C, 1)    f32 per-class alpha column           (only if has_alpha)
    f_part_ref: (1, 1, T) f32 lane-wise partial of (1-pt)^g * (-logpt)
    a_part_ref: (1, 1, T) f32 lane-wise partial of alpha[target] (only if has_alpha)
    """
    if has_alpha:
        x_ref, t_ref, alpha_ref, f_part_ref, a_part_ref = refs
    else:
        x_ref, t_ref, f_part_ref = refs
        alpha_ref = a_part_ref = None

    p = pl.program_id(1)   # parallel spatial split (v7x megacore)
    h = pl.program_id(2)   # spatial tile within split (reduction axis)

    @pl.when(h == 0)
    def _():
        f_part_ref[...] = jnp.zeros_like(f_part_ref)
        if has_alpha:
            a_part_ref[...] = jnp.zeros_like(a_part_ref)

    x = x_ref[...].astype(jnp.float32)          # (B, C, T)
    t = t_ref[...]                              # (B, 1, T) int32
    b, c, tt = x.shape

    # Stable softmax pieces over the class (sublane) axis; exp is computed
    # once and reused for both pt and the log-sum-exp.
    m = jnp.max(x, axis=1, keepdims=True)                            # (B, 1, T)
    e = jnp.exp(x - m)                                               # (B, C, T)
    s = jnp.sum(e, axis=1, keepdims=True)                            # (B, 1, T)

    # Gather at the target class via a bool mask (no f32 one-hot).
    classes = lax.broadcasted_iota(jnp.int32, (b, c, tt), 1)
    tmask = classes == t                                             # (B, C, T)
    x_t = jnp.sum(jnp.where(tmask, x, 0.0), axis=1, keepdims=True)   # (B, 1, T)
    e_t = jnp.sum(jnp.where(tmask, e, 0.0), axis=1, keepdims=True)   # (B, 1, T)

    logpt = x_t - m - jnp.log(s)                                     # log softmax_t
    pt = e_t * pl.reciprocal(s, approx=True)                         # softmax_t

    one_minus = 1.0 - pt
    g = float(gamma)
    if g == 2.0:                              # common case: two VPU multiplies
        w = one_minus * one_minus
    elif g == float(int(g)) and 0 <= int(g) <= 4:
        w = one_minus ** int(g)
    else:
        w = jnp.power(one_minus, g)
    focal = w * (-logpt)                                             # (B, 1, T)

    if has_alpha:
        a_col = alpha_ref[...].reshape(1, c, 1)                      # (1, C, 1)
        a_t = jnp.sum(jnp.where(tmask, a_col, 0.0), axis=1, keepdims=True)

    # Mask lanes past the true spatial extent (ragged last tile and clamped
    # overflow tiles from the parallel split).  Static no-op when the tiling
    # covers S exactly.  Class reductions above are per-lane, so any NaN/inf
    # from padded lanes is fully discarded here.
    if needs_mask:
        sb = p * tiles_per_split + h
        lane = lax.broadcasted_iota(jnp.int32, (1, 1, tt), 2)
        valid = (sb * tile_s + lane) < spatial
        focal = jnp.where(valid, focal, 0.0)
        if has_alpha:
            a_t = jnp.where(valid, a_t, 0.0)

    # Lane-wise accumulation only; the scalar collapse happens in the wrapper.
    f_part_ref[...] += jnp.sum(focal, axis=0, keepdims=True)
    if has_alpha:
        a_part_ref[...] += jnp.sum(a_t, axis=0, keepdims=True)


def _largest_divisor_leq(n, k):
    k = max(1, min(n, k))
    for d in range(k, 0, -1):
        if n % d == 0:
            return d
    return 1


def focal_loss(x, target, alpha=None, gamma=2.0, size_average=True,
               max_tile_s=32768):
    """Pallas focal loss matching FocalLoss.forward (smooth=None path)."""
    num_class = x.shape[1]
    has_alpha = alpha is not None

    if has_alpha:
        # list/array alpha -> normalized column, matching the module init.
        alpha_col = jnp.asarray(alpha, jnp.float32).reshape(num_class, 1)
        alpha_col = alpha_col / jnp.sum(alpha_col)
    # alpha=None -> torch.ones(num_class, 1): alpha_t == 1 everywhere, so the
    # gather, its input, and its accumulator are dropped entirely (fast path).

    # Native layout: (N, C, S) with S = flattened spatial on the lane axis
    # (no HBM transpose for the dense-prediction path).
    if x.ndim > 2:
        n0 = x.shape[0]
        x3 = x.reshape(n0, num_class, -1)
        t3 = target.reshape(n0, 1, -1).astype(jnp.int32)
    else:
        # Plain (B, C) logits: one small XLA transpose puts the batch on the
        # lane axis (class stays on sublanes); cheap at 2-D sizes and keeps a
        # single kernel variant.
        x3 = x.T[None]
        t3 = target.reshape(1, 1, -1).astype(jnp.int32)

    N, C, S = x3.shape
    M = N * S
    n_out = 2 if has_alpha else 1

    # --- VMEM-budgeted tile selection --------------------------------------
    try:
        vmem_cap = int(pltpu.get_tpu_info().vmem_capacity_bytes)
    except Exception:                      # conservative fallback (v7x-sized)
        vmem_cap = 64 * 1024 * 1024
    vmem_limit = min(vmem_cap * 3 // 4, 100 * 1024 * 1024)
    budget = max(8 * 1024 * 1024, vmem_limit // 2)

    x_bytes = jnp.dtype(x3.dtype).itemsize
    # Per lane, per batch row: double-buffered logits + int32 targets, plus
    # live f32 (C,T) intermediates (cast x, exp, class mask) and a few (1,T)
    # rows.  Accumulator bytes are per lane, independent of the batch fold.
    row_bytes = 2 * (C * x_bytes + 4) + (3 * C + 6) * 4
    out_bytes = 2 * 4 * n_out

    s_pad = -(-S // 128) * 128
    # Fold small spatial problems over the batch so each grid step does a
    # full lane-dense tile of work instead of one tiny step per batch element.
    if s_pad * row_bytes <= budget // 8:
        max_fold = max(1, budget // (s_pad * row_bytes + out_bytes))
        block_b = _largest_divisor_leq(N, min(16, max_fold))
    else:
        block_b = 1

    cap = budget // (row_bytes * block_b + out_bytes)
    cap = max(128, cap // 128 * 128)
    tile_s = min(s_pad, cap, max(128, (max_tile_s // 128) * 128))

    NB = N // block_b
    total_tiles = -(-S // tile_s)
    # v7x megacore: when the batch axis collapses to a single block, split the
    # spatial tiles into two parallel groups (a no-op loop on v5e/v6e).
    P = 2 if (NB == 1 and total_tiles >= 2) else 1
    NH = -(-total_tiles // P)
    need_clamp = (P * NH) > total_tiles          # overflow tiles get clamped
    needs_mask = (P * NH * tile_s) != S          # any padded lanes at all

    kernel = functools.partial(
        _focal_kernel, gamma=float(gamma), spatial=S, tile_s=tile_s,
        tiles_per_split=NH, has_alpha=has_alpha, needs_mask=needs_mask)

    def _sp(pp, hh):                              # spatial block index
        sb = pp * NH + hh
        return jnp.minimum(sb, total_tiles - 1) if need_clamp else sb

    in_specs = [
        pl.BlockSpec((block_b, C, tile_s), lambda nb, p, h: (nb, 0, _sp(p, h))),
        pl.BlockSpec((block_b, 1, tile_s), lambda nb, p, h: (nb, 0, _sp(p, h))),
    ]
    args = [x3, t3]
    if has_alpha:
        in_specs.append(pl.BlockSpec((C, 1), lambda nb, p, h: (0, 0)))
        args.append(alpha_col)

    def _out_spec():
        return pl.BlockSpec((1, 1, tile_s), lambda nb, p, h: (nb * P + p, 0, 0))

    part_shape = jax.ShapeDtypeStruct((NB * P, 1, tile_s), jnp.float32)
    if has_alpha:
        out_shape = (part_shape, part_shape)
        out_specs = (_out_spec(), _out_spec())
    else:
        out_shape = part_shape
        out_specs = _out_spec()

    parts = pl.pallas_call(
        kernel,
        out_shape=out_shape,
        grid_spec=pltpu.PrefetchScalarGridSpec(
            num_scalar_prefetch=0,
            grid=(NB, P, NH),
            in_specs=in_specs,
            out_specs=out_specs),
        compiler_params=pltpu.CompilerParams(
            dimension_semantics=("parallel", "parallel", "arbitrary"),
            vmem_limit_bytes=int(vmem_limit)),
    )(*args)

    # PyTorch quirk (kept on purpose): the (M,1,1) x (M,) broadcast makes an
    # (M,1,M) outer product whose mean()/sum() factorizes into the two sums.
    if has_alpha:
        f_part, a_part = parts
        sum_f = jnp.sum(f_part)
        sum_a = jnp.sum(a_part)
        if size_average:
            return (sum_a / M) * (sum_f / M)
        return sum_a * sum_f
    sum_f = jnp.sum(parts)
    if size_average:
        return sum_f / M            # mean(alpha_t) == 1 for alpha=None
    return M * sum_f                # sum(alpha_t) == M for alpha=None


def focal_loss_ref(x, target, alpha=None, gamma=2.0, size_average=True):
    """Pure-JAX reference reproducing the PyTorch module (incl. its
    alpha-broadcast quirk and the +1e-10 epsilon)."""
    n, c = x.shape[0], x.shape[1]
    logit = jax.nn.softmax(x.astype(jnp.float32), axis=1)
    if x.ndim > 2:
        logit = logit.reshape(n, c, -1).transpose(0, 2, 1).reshape(-1, c)
    t = target.reshape(-1)
    if alpha is None:
        alpha_v = jnp.ones((c,), jnp.float32)
    else:
        alpha_v = jnp.asarray(alpha, jnp.float32).reshape(-1)
        alpha_v = alpha_v / jnp.sum(alpha_v)
    one_hot = jax.nn.one_hot(t, c, dtype=jnp.float32)
    pt = jnp.sum(one_hot * logit, axis=1) + 1e-10
    logpt = jnp.log(pt)
    a_t = alpha_v[t]
    f = jnp.power(1.0 - pt, gamma) * (-logpt)
    if size_average:
        return jnp.mean(a_t) * jnp.mean(f)
    return jnp.sum(a_t) * jnp.sum(f)


if __name__ == "__main__":
    key = jax.random.PRNGKey(0)

    def check(name, got, want, tol=2e-3):
        got = float(jax.block_until_ready(got))
        want = float(jax.block_until_ready(want))
        assert abs(got - want) <= tol * max(1.0, abs(want)), (name, got, want)

    # 1) Main path: 4-D logits, alpha=None, mean reduction.
    k1, k2 = jax.random.split(key)
    N, C, H, W = 2, 4, 16, 16
    x = jax.random.normal(k1, (N, C, H, W), dtype=jnp.float32)
    tgt = jax.random.randint(k2, (N, H, W), 0, C, dtype=jnp.int32)
    check("mean/alpha=None", focal_loss(x, tgt), focal_loss_ref(x, tgt))

    # 2) Sum reduction (same kernel, different wrapper math).
    check("sum/alpha=None",
          focal_loss(x, tgt, size_average=False),
          focal_loss_ref(x, tgt, size_average=False))

    # 3) Explicit per-class alpha (kernel variant with the alpha gather).
    alpha = [1.0, 2.0, 3.0, 4.0]
    check("mean/alpha",
          focal_loss(x, tgt, alpha=alpha),
          focal_loss_ref(x, tgt, alpha=alpha))

    # 4) Ragged spatial + forced tiling + parallel spatial split (N == 1).
    k3, k4 = jax.random.split(k1)
    x2 = jax.random.normal(k3, (1, 4, 16, 19), dtype=jnp.float32)
    t2 = jax.random.randint(k4, (1, 16, 19), 0, 4, dtype=jnp.int32)
    check("ragged/split",
          focal_loss(x2, t2, max_tile_s=128),
          focal_loss_ref(x2, t2))

    # 5) Plain 2-D (batch, num_class) logits, integer gamma != 2.
    k5, k6 = jax.random.split(k2)
    x2d = jax.random.normal(k5, (64, 4), dtype=jnp.float32)
    t2d = jax.random.randint(k6, (64,), 0, 4, dtype=jnp.int32)
    check("2d/gamma=3",
          focal_loss(x2d, t2d, gamma=3),
          focal_loss_ref(x2d, t2d, gamma=3))

    print("KERNEL_OK")
</pallas_src>

<mosaic_0001>
module attributes {stable_mosaic.version = 11 : i64} {
  func.func @_focal_kernel(%arg0: i32, %arg1: i32, %arg2: i32, %arg3: memref<2x4x256xf32, #tpu.memory_space<vmem>>, %arg4: memref<2x1x256xi32, #tpu.memory_space<vmem>>, %arg5: memref<1x1x256xf32, #tpu.memory_space<vmem>>) attributes {dimension_semantics = [#tpu.dimension_semantics<parallel>, #tpu.dimension_semantics<parallel>, #tpu.dimension_semantics<arbitrary>], iteration_bounds = array<i64: 1, 1, 1>, scalar_prefetch = 0 : i64, scratch_operands = 0 : i64, tpu.core_type = #tpu.core_type<tc>, window_params = [{transform_indices = @transform_0, window_bounds = array<i64: 2, 4, 256>}, {transform_indices = @transform_1, window_bounds = array<i64: 2, 1, 256>}, {transform_indices = @transform_2, window_bounds = array<i64: 1, 1, 256>}]} {
    %c0_i32 = arith.constant 0 : i32
    %0 = arith.cmpi eq, %arg2, %c0_i32 : i32
    %1 = arith.extui %0 : i1 to i32
    %c0_i32_0 = arith.constant 0 : i32
    %2 = arith.cmpi ne, %1, %c0_i32_0 : i32
    scf.if %2 {
      %cst_20 = arith.constant 0.000000e+00 : f32
      %39 = vector.broadcast %cst_20 : f32 to vector<1x1x256xf32>
      %c0_21 = arith.constant 0 : index
      %c0_22 = arith.constant 0 : index
      %c0_23 = arith.constant 0 : index
      %40 = vector.load %arg5[%c0_21, %c0_22, %c0_23] : memref<1x1x256xf32, #tpu.memory_space<vmem>>, vector<1x1x256xf32>
      tpu.vector_store %arg5[%c0_21, %c0_22, %c0_23], %39 {strides = array<i32>} : memref<1x1x256xf32, #tpu.memory_space<vmem>>, vector<1x1x256xf32>,
    } else {
    }
    %c0 = arith.constant 0 : index
    %c0_1 = arith.constant 0 : index
    %c0_2 = arith.constant 0 : index
    %3 = vector.load %arg3[%c0, %c0_1, %c0_2] : memref<2x4x256xf32, #tpu.memory_space<vmem>>, vector<2x4x256xf32>
    %c0_3 = arith.constant 0 : index
    %c0_4 = arith.constant 0 : index
    %c0_5 = arith.constant 0 : index
    %4 = vector.load %arg4[%c0_3, %c0_4, %c0_5] : memref<2x1x256xi32, #tpu.memory_space<vmem>>, vector<2x1x256xi32>
    %cst = arith.constant dense<0xFF800000> : vector<2x256xf32>
    %5 = vector.multi_reduction <maximumf>, %3, %cst [1] : vector<2x4x256xf32> to vector<2x256xf32>
    %6 = vector.shape_cast %5 : vector<2x256xf32> to vector<2x1x256xf32>
    %7 = vector.broadcast %6 : vector<2x1x256xf32> to vector<2x4x256xf32>
    %8 = arith.subf %3, %7 : vector<2x4x256xf32>
    %9 = math.exp %8 : vector<2x4x256xf32>
    %cst_6 = arith.constant dense<0.000000e+00> : vector<2x256xf32>
    %10 = vector.multi_reduction <add>, %9, %cst_6 [1] : vector<2x4x256xf32> to vector<2x256xf32>
    %11 = vector.shape_cast %10 : vector<2x256xf32> to vector<2x1x256xf32>
    %12 = tpu.iota {dimensions = array<i32: 1>} : vector<2x4x256xi32>
    %13 = vector.broadcast %4 : vector<2x1x256xi32> to vector<2x4x256xi32>
    %14 = arith.cmpi eq, %12, %13 : vector<2x4x256xi32>
    %cst_7 = arith.constant 0.000000e+00 : f32
    %15 = vector.broadcast %cst_7 : f32 to vector<2x4x256xf32>
    %16 = arith.select %14, %3, %15 : vector<2x4x256xi1>, vector<2x4x256xf32>
    %cst_8 = arith.constant dense<0.000000e+00> : vector<2x256xf32>
    %17 = vector.multi_reduction <add>, %16, %cst_8 [1] : vector<2x4x256xf32> to vector<2x256xf32>
    %18 = vector.shape_cast %17 : vector<2x256xf32> to vector<2x1x256xf32>
    %cst_9 = arith.constant 0.000000e+00 : f32
    %19 = vector.broadcast %cst_9 : f32 to vector<2x4x256xf32>
    %20 = arith.select %14, %9, %19 : vector<2x4x256xi1>, vector<2x4x256xf32>
    %cst_10 = arith.constant dense<0.000000e+00> : vector<2x256xf32>
    %21 = vector.multi_reduction <add>, %20, %cst_10 [1] : vector<2x4x256xf32> to vector<2x256xf32>
    %22 = vector.shape_cast %21 : vector<2x256xf32> to vector<2x1x256xf32>
    %23 = arith.subf %18, %6 : vector<2x1x256xf32>
    %24 = math.log %11 : vector<2x1x256xf32>
    %25 = arith.subf %23, %24 : vector<2x1x256xf32>
    %26 = tpu.reciprocal %11 {approx = true} : vector<2x1x256xf32> -> vector<2x1x256xf32>
    %27 = arith.mulf %22, %26 : vector<2x1x256xf32>
    %cst_11 = arith.constant 1.000000e+00 : f32
    %28 = vector.broadcast %cst_11 : f32 to vector<2x1x256xf32>
    %29 = arith.subf %28, %27 : vector<2x1x256xf32>
    %30 = arith.mulf %29, %29 : vector<2x1x256xf32>
    %cst_12 = arith.constant 0.000000e+00 : f32
    %31 = vector.broadcast %cst_12 : f32 to vector<2x1x256xf32>
    %32 = arith.subf %31, %25 : vector<2x1x256xf32>
    %33 = arith.mulf %30, %32 : vector<2x1x256xf32>
    %c0_13 = arith.constant 0 : index
    %c0_14 = arith.constant 0 : index
    %c0_15 = arith.constant 0 : index
    %34 = vector.load %arg5[%c0_13, %c0_14, %c0_15] : memref<1x1x256xf32, #tpu.memory_space<vmem>>, vector<1x1x256xf32>
    %cst_16 = arith.constant dense<0.000000e+00> : vector<1x256xf32>
    %35 = vector.multi_reduction <add>, %33, %cst_16 [0] : vector<2x1x256xf32> to vector<1x256xf32>
    %36 = vector.shape_cast %35 : vector<1x256xf32> to vector<1x1x256xf32>
    %37 = arith.addf %34, %36 : vector<1x1x256xf32>
    %c0_17 = arith.constant 0 : index
    %c0_18 = arith.constant 0 : index
    %c0_19 = arith.constant 0 : index
    %38 = vector.load %arg5[%c0_17, %c0_18, %c0_19] : memref<1x1x256xf32, #tpu.memory_space<vmem>>, vector<1x1x256xf32>
    tpu.vector_store %arg5[%c0_17, %c0_18, %c0_19], %37 {strides = array<i32>} : memref<1x1x256xf32, #tpu.memory_space<vmem>>, vector<1x1x256xf32>,
    return
  }
  func.func @transform_0(%arg0: i32, %arg1: i32, %arg2: i32) -> (i32, i32, i32) {
    %c1_i32 = arith.constant 1 : i32
    %0 = arith.muli %arg1, %c1_i32 : i32
    %1 = arith.addi %0, %arg2 : i32
    %c0_i32 = arith.constant 0 : i32
    %c0_i32_0 = arith.constant 0 : i32
    return %arg0, %c0_i32, %1 : i32, i32, i32
  }
  func.func @transform_1(%arg0: i32, %arg1: i32, %arg2: i32) -> (i32, i32, i32) {
    %c1_i32 = arith.constant 1 : i32
    %0 = arith.muli %arg1, %c1_i32 : i32
    %1 = arith.addi %0, %arg2 : i32
    %c0_i32 = arith.constant 0 : i32
    %c0_i32_0 = arith.constant 0 : i32
    return %arg0, %c0_i32, %1 : i32, i32, i32
  }
  func.func @transform_2(%arg0: i32, %arg1: i32, %arg2: i32) -> (i32, i32, i32) {
    %c1_i32 = arith.constant 1 : i32
    %0 = arith.muli %arg0, %c1_i32 : i32
    %1 = arith.addi %0, %arg1 : i32
    %c0_i32 = arith.constant 0 : i32
    %c0_i32_0 = arith.constant 0 : i32
    %c0_i32_1 = arith.constant 0 : i32
    return %1, %c0_i32, %c0_i32_0 : i32, i32, i32
  }
}

</mosaic_0001>

<bundles_post_ra>
// kernel: tpu_custom_call.1
= control target key start
LH: loop header
LB: loop body
LE: loop exit
PB: predicated region body
PF: predicated region fallthrough
CT: control target
= control target key end

     0   :  { %7 = vsyncpa [#allocation3], 0  ;;  %s550_s0 = inlined_call_operand.hbm [shape: f32[2,4,256], index: 0, kind: input, shape index: {}]   ;;  %s551_s1 = inlined_call_operand.hbm [shape: s32[2,1,256], index: 1, kind: input, shape index: {}]   ;;  %s552_s2 = inlined_call_operand.hbm [shape: f32[1,1,256], index: 2, kind: output, shape index: {}]  }
   0x1   :  { %8 = vsyncpa [#allocation6], 0 }
   0x2   :  { %9 = vsyncpa [#allocation4], 0  ;;  %s425_s9 = smov [#allocation2]   ;;  %s353_s13 = scalar_lea.hbm %s550_s0, 256 }
   0x3   :  { %s19_s10 = sshll.u32 %s425_s9, 4  ;;  %p354_p0 = scmp.ne.s32.totalorder %s550_s0, %s353_s13  ;;  %s20_s10 = int_to_ptr.vmem [resolvable:$true] %s19_s10 }
   0x4   :  { %p357_p1 = scmp.lt.u32.totalorder %s353_s13, %s550_s0 }
   0x6   :  { %p359_p2 = pnand %p357_p1, %p354_p0 }
   0x8   :  { %362 = shalt.err (!%p359_p2)
}
   0x9   :  { %s363_s18 = scalar_lea.vmem %s20_s10, 256  ;;  %p368_p4 = scmp.lt.s32.totalorder %s20_s10, %s20_s10 }
   0xa   :  { %p364_p3 = scmp.ne.s32.totalorder %s20_s10, %s363_s18  ;;  %p369_p5 = scmp.lt.s32.totalorder %s363_s18, %s363_s18 }
   0xc   :  { %p370_p6 = por %p369_p5, %p368_p4 }
   0xe   :  { %p371_p7 = pnand %p370_p6, %p364_p3 }
  0x10   :  { %374 = shalt.err (!%p371_p7)
}
  0x11   :  { %s426_s19 = smov 128   ;;  %s427_s20 = smov 8  }
  0x12   :  { %25 = dma.hbm_to_vmem [thread:$0]  %s550_s0, 256, %s20_s10, [#allocation3], %s426_s19, %s426_s19, %s427_s20  }
  0x13   :  { %s428_s23 = smov [#allocation5]   ;;  %s375_s27 = scalar_lea.hbm %s551_s1, 64 }
  0x14   :  { %s35_s24 = sshll.u32 %s428_s23, 4  ;;  %p376_p8 = scmp.ne.s32.totalorder %s551_s1, %s375_s27  ;;  %s36_s24 = int_to_ptr.vmem [resolvable:$true] %s35_s24 }
  0x15   :  { %p379_p9 = scmp.lt.u32.totalorder %s375_s27, %s551_s1 }
  0x17   :  { %p381_p10 = pnand %p379_p9, %p376_p8 }
  0x19   :  { %384 = shalt.err (!%p381_p10)
}
  0x1a   :  { %s385_s4 = scalar_lea.vmem %s36_s24, 64  ;;  %p390_p12 = scmp.lt.s32.totalorder %s36_s24, %s36_s24 }
  0x1b   :  { %p386_p11 = scmp.ne.s32.totalorder %s36_s24, %s385_s4  ;;  %p391_p13 = scmp.lt.s32.totalorder %s385_s4, %s385_s4 }
  0x1d   :  { %p392_p0 = por %p391_p13, %p390_p12 }
  0x1f   :  { %p393_p1 = pnand %p392_p0, %p386_p11 }
  0x21   :  { %396 = shalt.err (!%p393_p1)
}
  0x22   :  { %s429_s0 = smov 32   ;;  %s430_s5 = smov 2  }
  0x23   :  { %41 = dma.hbm_to_vmem [thread:$0]  %s551_s1, 64, %s36_s24, [#allocation6], %s429_s0, %s429_s0, %s430_s5  }
  0x24   :  { %419 = dma.done.wait [#allocation3], 256  }
  0x25   :  { %420 = vsyncadd [#allocation3], 4294967040 }
  0x26   :  { %421 = dma.done.wait [#allocation6], 64  }
  0x27   :  { %422 = vsyncadd [#allocation6], 4294967232  ;;  %v57_v0 = vlaneseq  ;;  %v431_v2 = vmov 0.0   ;;  %vm72_vm1 = vcmask 1043456   ;;  %v62_v3 = vld [vmem:[#allocation2] sm:$0xff]  ;;  %v63_v4 = vld [vmem:[#allocation2 + $0x8] sm:$0xff] }
  0x28   :  { %v68_v5 = vcombine.high %v62_v3, %v62_v3  ;;  %v69_v6 = vcombine.high %v63_v4, %v63_v4  ;;  %v73_v7 = vsel %vm72_vm1, %v62_v3, -inf  ;;  %v87_v8 = vsel %vm72_vm1, %v63_v4, -inf  ;;  %v64_v23 = vld [vmem:[#allocation5] sm:$0x3]  ;;  %v65_v34 = vld [vmem:[#allocation5 + $0x2] sm:$0x3] }
  0x29   :  { %vm473_vm0 = vcmp.lt.s32.totalorder %v57_v0, 256  ;;  %v74_v9 = vrot.slane %v73_v7, 4  ;;  %v88_v10 = vrot.slane %v87_v8, 4  ;;  %v481_v11 = vshrl.u32 %v57_v0, 7  ;;  %s433_s1 = smov [#allocation7]  }
  0x2a   :  { %61 = vst.msk [vmem:[#allocation7] sm:$0x3] %vm473_vm0, %v431_v2  ;;  %v80_v12 = vsel %vm72_vm1, %v68_v5, -inf  ;;  %v94_v13 = vsel %vm72_vm1, %v69_v6, -inf  ;;  %s312_s8 = sshll.u32 %s433_s1, 4  ;;  %s313_s8 = int_to_ptr.vmem [resolvable:$true] %s312_s8 }
  0x2b   :  { %v75_v14 = vmax.f32 %v73_v7, %v74_v9  ;;  %v81_v15 = vrot.slane %v80_v12, 4  ;;  %v89_v16 = vmax.f32 %v87_v8, %v88_v10  ;;  %v95_v17 = vrot.slane %v94_v13, 4  ;;  %s397_s9 = scalar_lea.vmem %s313_s8, 32  ;;  %p402_p3 = scmp.lt.s32.totalorder %s313_s8, %s313_s8 }
  0x2c   :  { %v153_v22 = vsub.s32 0, %v481_v11  ;;  %v157_v28 = vsub.s32 1, %v481_v11  ;;  %p398_p2 = scmp.ne.s32.totalorder %s313_s8, %s397_s9  ;;  %p403_p4 = scmp.lt.s32.totalorder %s397_s9, %s397_s9 }
  0x2d   :  { %v76_v18 = vrot.slane %v75_v14, 2  ;;  %v82_v19 = vmax.f32 %v80_v12, %v81_v15  ;;  %v90_v20 = vrot.slane %v89_v16, 2  ;;  %v96_v21 = vmax.f32 %v94_v13, %v95_v17 }
  0x2e   :  { %v154_v33 = vrot.slane %v64_v23, %v153_v22  ;;  %v158_v41 = vrot.slane %v64_v23, %v157_v28  ;;  %v162_v42 = vrot.slane %v65_v34, %v153_v22  ;;  %v166_v43 = vrot.slane %v65_v34, %v157_v28  ;;  %p404_p5 = por %p403_p4, %p402_p3 }
  0x2f   :  { %v77_v24 = vmax.f32 %v75_v14, %v76_v18  ;;  %v83_v25 = vrot.slane %v82_v19, 2  ;;  %v91_v26 = vmax.f32 %v89_v16, %v90_v20  ;;  %v97_v27 = vrot.slane %v96_v21, 2 }
  0x30   :  { %vm167_vm2 = vcmp.eq.s32.totalorder %v481_v11, %v154_v33  ;;  %vm168_vm3 = vcmp.eq.s32.totalorder %v481_v11, %v158_v41  ;;  %vm169_vm4 = vcmp.eq.s32.totalorder %v481_v11, %v162_v42  ;;  %vm170_vm5 = vcmp.eq.s32.totalorder %v481_v11, %v166_v43  ;;  %p405_p6 = pnand %p404_p5, %p398_p2 }
  0x31   :  { %v78_v29 = vrot.slane %v77_v24, 1  ;;  %v84_v30 = vmax.f32 %v82_v19, %v83_v25  ;;  %v92_v31 = vrot.slane %v91_v26, 1  ;;  %v98_v32 = vmax.f32 %v96_v21, %v97_v27 }
  0x32   :  { %v171_v48 = vsel %vm167_vm2, %v62_v3, 0.0  ;;  %v172_v51 = vsel %vm168_vm3, %v68_v5, 0.0  ;;  %v173_v52 = vsel %vm169_vm4, %v63_v4, 0.0  ;;  %v174_v53 = vsel %vm170_vm5, %v69_v6, 0.0 }
  0x33   :  { %v487_v35 = vmax.f32 %v77_v24, %v78_v29  ;;  %v85_v36 = vrot.slane %v84_v30, 1  ;;  %v489_v37 = vmax.f32 %v91_v26, %v92_v31  ;;  %v99_v38 = vrot.slane %v98_v32, 1 }
  0x34   :  { %v175_v54 = vsel %vm72_vm1, %v171_v48, 0.0  ;;  %v182_v56 = vsel %vm72_vm1, %v172_v51, 0.0  ;;  %v189_v57 = vsel %vm72_vm1, %v173_v52, 0.0  ;;  %v196_v58 = vsel %vm72_vm1, %v174_v53, 0.0 }
  0x35   :  { %v491_v39 = vmax.f32 %v84_v30, %v85_v36  ;;  %v493_v40 = vmax.f32 %v98_v32, %v99_v38  ;;  %v176_v55 = vrot.slane %v175_v54, 4  ;;  %v183_v59 = vrot.slane %v182_v56, 4 }
  0x36   :  { %v190_v60 = vrot.slane %v189_v57, 4  ;;  %v197_v61 = vrot.slane %v196_v58, 4 }
  0x37   :  { %v105_v44 = vcombine.low %v487_v35, %v491_v39  ;;  %v106_v45 = vcombine.low %v489_v37, %v493_v40  ;;  %v177_v62 = vadd.f32 %v176_v55, %v175_v54  ;;  %v184_v0 = vadd.f32 %v183_v59, %v182_v56 }
  0x38   :  { %v191_v2 = vadd.f32 %v190_v60, %v189_v57 }
  0x39   :  { %v109_v46 = vsub.f32 %v62_v3, %v105_v44  ;;  %v110_v47 = vsub.f32 %v63_v4, %v106_v45  ;;  %v198_v3 = vadd.f32 %v197_v61, %v196_v58  ;;  %v178_v7 = vrot.slane %v177_v62, 2 }
  0x3a   :  { %v185_v32 = vrot.slane %v184_v0, 2  ;;  %v192_v38 = vrot.slane %v191_v2, 2 }
  0x3b   :  { %v111_v49 = vmul.f32 1.442695, %v109_v46  ;;  %v113_v50 = vmul.f32 1.442695, %v110_v47  ;;  %v199_v44 = vrot.slane %v198_v3, 2  ;;  %v179_v52 = vadd.f32 %v178_v7, %v177_v62 }
  0x3c   :  { %v186_v56 = vadd.f32 %v185_v32, %v184_v0  ;;  %v193_v60 = vadd.f32 %v192_v38, %v191_v2 }
  0x3d   :  { %333 = vpow2.f32 %v111_v49 }
  0x3e   :  { %335 = vpow2.f32 %v113_v50  ;;  %v187_v62 = vrot.slane %v186_v56, 1  ;;  %v194_v7 = vrot.slane %v193_v60, 1 }
  0x47   :  { %v334_v63 = vpop.eup %333 }
  0x48   :  { %v336_v4 = vpop.eup %335  ;;  %v117_v5 = vcombine.high %v334_v63, %v334_v63  ;;  %v121_v6 = vsel %vm72_vm1, %v334_v63, 0.0  ;;  %v203_v8 = vsel %vm167_vm2, %v334_v63, 0.0 }
  0x49   :  { %v118_v9 = vcombine.high %v336_v4, %v336_v4  ;;  %v122_v10 = vrot.slane %v121_v6, 4  ;;  %v135_v12 = vsel %vm72_vm1, %v336_v4, 0.0  ;;  %v205_v13 = vsel %vm169_vm4, %v336_v4, 0.0 }
  0x4a   :  { %v128_v14 = vsel %vm72_vm1, %v117_v5, 0.0  ;;  %v136_v15 = vrot.slane %v135_v12, 4  ;;  %v204_v16 = vsel %vm168_vm3, %v117_v5, 0.0  ;;  %v207_v17 = vsel %vm72_vm1, %v203_v8, 0.0 }
  0x4b   :  { %v123_v18 = vadd.f32 %v122_v10, %v121_v6  ;;  %v129_v19 = vrot.slane %v128_v14, 4  ;;  %v142_v20 = vsel %vm72_vm1, %v118_v9, 0.0  ;;  %v206_v21 = vsel %vm170_vm5, %v118_v9, 0.0 }
  0x4c   :  { %v137_v22 = vadd.f32 %v136_v15, %v135_v12  ;;  %v143_v23 = vrot.slane %v142_v20, 4  ;;  %v208_v24 = vrot.slane %v207_v17, 4  ;;  %v214_v25 = vsel %vm72_vm1, %v204_v16, 0.0 }
  0x4d   :  { %v124_v26 = vrot.slane %v123_v18, 2  ;;  %v130_v27 = vadd.f32 %v129_v19, %v128_v14  ;;  %v215_v28 = vrot.slane %v214_v25, 4  ;;  %v221_v29 = vsel %vm72_vm1, %v205_v13, 0.0 }
  0x4e   :  { %v138_v30 = vrot.slane %v137_v22, 2  ;;  %v144_v31 = vadd.f32 %v143_v23, %v142_v20  ;;  %v222_v33 = vrot.slane %v221_v29, 4  ;;  %v228_v41 = vsel %vm72_vm1, %v206_v21, 0.0 }
  0x4f   :  { %v125_v34 = vadd.f32 %v124_v26, %v123_v18  ;;  %v131_v36 = vrot.slane %v130_v27, 2  ;;  %v209_v45 = vadd.f32 %v208_v24, %v207_v17  ;;  %v216_v48 = vadd.f32 %v215_v28, %v214_v25 }
  0x50   :  { %v139_v42 = vadd.f32 %v138_v30, %v137_v22  ;;  %v145_v43 = vrot.slane %v144_v31, 2  ;;  %v229_v49 = vrot.slane %v228_v41, 4  ;;  %v223_v53 = vadd.f32 %v222_v33, %v221_v29 }
  0x51   :  { %v126_v46 = vrot.slane %v125_v34, 1  ;;  %v132_v47 = vadd.f32 %v131_v36, %v130_v27  ;;  %v210_v61 = vrot.slane %v209_v45, 2  ;;  %v200_v4 = vadd.f32 %v199_v44, %v198_v3 }
  0x52   :  { %v140_v50 = vrot.slane %v139_v42, 1  ;;  %v146_v51 = vadd.f32 %v145_v43, %v144_v31  ;;  %v230_v57 = vadd.f32 %v229_v49, %v228_v41  ;;  %v217_v5 = vrot.slane %v216_v48, 2 }
  0x53   :  { %v127_v54 = vadd.f32 %v126_v46, %v125_v34  ;;  %v133_v55 = vrot.slane %v132_v47, 1  ;;  %v180_v8 = vrot.slane %v179_v52, 1  ;;  %v224_v9 = vrot.slane %v223_v53, 2 }
  0x54   :  { %v141_v58 = vadd.f32 %v140_v50, %v139_v42  ;;  %v147_v59 = vrot.slane %v146_v51, 1  ;;  %v231_v10 = vrot.slane %v230_v57, 2  ;;  %v211_v12 = vadd.f32 %v210_v61, %v209_v45 }
  0x55   :  { %v134_v63 = vadd.f32 %v133_v55, %v132_v47  ;;  %337 = vlog2.f32 %v127_v54  ;;  %v201_v0 = vrot.slane %v200_v4, 1  ;;  %v218_v13 = vadd.f32 %v217_v5, %v216_v48 }
  0x56   :  { %v148_v6 = vadd.f32 %v147_v59, %v146_v51  ;;  %339 = vlog2.f32 %v141_v58  ;;  %v181_v14 = vadd.f32 %v180_v8, %v179_v52  ;;  %v225_v2 = vadd.f32 %v224_v9, %v223_v53 }
  0x57   :  { %341 = vlog2.f32 %v134_v63  ;;  %v232_v15 = vadd.f32 %v231_v10, %v230_v57  ;;  %v188_v3 = vadd.f32 %v187_v62, %v186_v56  ;;  %v195_v16 = vadd.f32 %v194_v7, %v193_v60 }
  0x58   :  { %343 = vlog2.f32 %v148_v6  ;;  %v212_v17 = vrot.slane %v211_v12, 1  ;;  %v202_v18 = vadd.f32 %v201_v0, %v200_v4  ;;  %v219_v19 = vrot.slane %v218_v13, 1 }
  0x59   :  { %345 = vrcp.f32 %v127_v54  ;;  %v226_v20 = vrot.slane %v225_v2, 1  ;;  %v235_v21 = vsub.f32 %v181_v14, %v487_v35  ;;  %v233_v23 = vrot.slane %v232_v15, 1  ;;  %v275_v14 = vld [vmem:[#allocation7] sm:$0x3] }
  0x5a   :  { %347 = vrcp.f32 %v134_v63  ;;  %v213_v25 = vadd.f32 %v212_v17, %v211_v12  ;;  %v236_v26 = vsub.f32 %v188_v3, %v491_v39  ;;  %v237_v27 = vsub.f32 %v195_v16, %v489_v37 }
  0x5b   :  { %349 = vrcp.f32 %v141_v58  ;;  %v220_v30 = vadd.f32 %v219_v19, %v218_v13  ;;  %v238_v31 = vsub.f32 %v202_v18, %v493_v40  ;;  %v227_v34 = vadd.f32 %v226_v20, %v225_v2 }
  0x5c   :  { %351 = vrcp.f32 %v148_v6  ;;  %v234_v35 = vadd.f32 %v233_v23, %v232_v15  ;;  %v432_v54 = vmov 1966171168  }
  0x5d   :  { %v282_v55 = vunpack.c.l.s4 %v432_v54 }
  0x5f   :  { %v338_v22 = vpop.eup %337  ;;  %v283_v8 = vunpack.c.0.s8 %v282_v55 }
  0x60   :  { %v340_v24 = vpop.eup %339  ;;  %v240_v28 = vmul.f32 0.6931472, %v338_v22 }
  0x61   :  { %v342_v29 = vpop.eup %341  ;;  %v244_v32 = vmul.f32 0.6931472, %v340_v24  ;;  %v286_v12 = vsub.s32 %v283_v8, %v481_v11 }
  0x62   :  { %v344_v33 = vpop.eup %343  ;;  %v242_v36 = vmul.f32 0.6931472, %v342_v29  ;;  %v247_v38 = vsub.f32 %v235_v21, %v240_v28 }
  0x63   :  { %v346_v41 = vpop.eup %345  ;;  %v246_v42 = vmul.f32 0.6931472, %v344_v33  ;;  %v249_v45 = vsub.f32 %v237_v27, %v244_v32 }
  0x64   :  { %v348_v43 = vpop.eup %347  ;;  %v248_v44 = vsub.f32 %v236_v26, %v242_v36  ;;  %v255_v46 = vmul.f32 %v346_v41, %v213_v25  ;;  %v267_v51 = vsub.f32 0.0, %v247_v38 }
  0x65   :  { %v350_v39 = vpop.eup %349  ;;  %v250_v47 = vsub.f32 %v238_v31, %v246_v42  ;;  %v256_v37 = vmul.f32 %v348_v43, %v220_v30  ;;  %v269_v58 = vsub.f32 0.0, %v249_v45 }
  0x66   :  { %v352_v48 = vpop.eup %351  ;;  %v257_v49 = vmul.f32 %v350_v39, %v227_v34  ;;  %v259_v50 = vsub.f32 1.0, %v255_v46  ;;  %v268_v53 = vsub.f32 0.0, %v248_v44 }
  0x67   :  { %v258_v40 = vmul.f32 %v352_v48, %v234_v35  ;;  %v260_v52 = vsub.f32 1.0, %v256_v37  ;;  %v270_v61 = vsub.f32 0.0, %v250_v47 }
  0x68   :  { %v261_v56 = vsub.f32 1.0, %v257_v49  ;;  %v263_v57 = vmul.f32 %v259_v50, %v259_v50 }
  0x69   :  { %v262_v59 = vsub.f32 1.0, %v258_v40  ;;  %v264_v60 = vmul.f32 %v260_v52, %v260_v52 }
  0x6a   :  { %v265_v63 = vmul.f32 %v261_v56, %v261_v56  ;;  %v271_v4 = vmul.f32 %v267_v51, %v263_v57 }
  0x6b   :  { %v266_v5 = vmul.f32 %v262_v59, %v262_v59  ;;  %v272_v6 = vmul.f32 %v268_v53, %v264_v60 }
  0x6c   :  { %v273_v9 = vmul.f32 %v269_v58, %v265_v63 }
  0x6d   :  { %v274_v10 = vmul.f32 %v270_v61, %v266_v5 }
  0x6e   :  { %v276_v62 = vadd.f32 %v273_v9, %v271_v4 }
  0x6f   :  { %v277_v7 = vadd.f32 %v274_v10, %v272_v6 }
  0x71   :  { %v280_v0 = vcombine.low %v276_v62, %v277_v7 }
  0x73   :  { %v287_v13 = vrot.slane %v280_v0, %v286_v12 }
  0x75   :  { %v294_v2 = vrot.slane %v287_v13, %v286_v12 }
  0x77   :  { %v296_v15 = vadd.f32 %v294_v2, %v275_v14 }
  0x79   :  { %301 = vst.msk [vmem:[#allocation7] sm:$0x3] %vm473_vm0, %v296_v15 }
  0x7a   :  { %408 = shalt.err (!%p405_p6)
}
  0x7b   :  { %s409_s12 = scalar_lea.hbm %s552_s2, 32 }
  0x7c   :  { %p410_p7 = scmp.ne.s32.totalorder %s552_s2, %s409_s12  ;;  %p413_p8 = scmp.lt.u32.totalorder %s409_s12, %s552_s2 }
  0x7e   :  { %p415_p9 = pnand %p413_p8, %p410_p7 }
  0x80   :  { %418 = shalt.err (!%p415_p9)
}
  0x81   :  { %315 = dma.vmem_to_hbm [thread:$0]  %s313_s8, 32, %s552_s2, [#allocation4]  }
  0x82   :  { %423 = dma.done.wait [#allocation4], 32  }
  0x83   :  { %424 = vsyncadd [#allocation4], 4294967264 }
  0x84   :  { %319 = vsyncpa [#allocation3], 1 }
  0x85   :  { %320 = vsyncpa [#allocation6], 1 }
  0x86   :  { %321 = vsyncpa [#allocation4], 1 }

</bundles_post_ra>
